<compile_context>
chip_gen: v7x
topology: tpu7x:2x2x1
jax: 0.10.0
libtpu: 0.0.40
codegen_flags: <defaults>
</compile_context>

<pallas_src>
import jax
import jax.numpy as jnp
from jax.experimental import pallas as pl
from jax.experimental.pallas import tpu as pltpu

INPUT_SIZE = 14          # real board-feature width
PAD_IN = 128             # fc1 K padded to one full lane width
HIDDEN_SIZE = 256
PAD_OUT = 128            # fc3 output padded to one full lane width (col 0 real)
MAX_CHUNK = 256          # rows per grid step (fills MXU rows on v6e/v7x)


def td_network_kernel(x_ref, w1_ref, b1_ref, w2_ref, b2_ref, w3_ref, b3_ref, o_ref):
    # fc1 + sigmoid   (x and W1 are bf16, accumulate in f32)
    h1 = jnp.dot(x_ref[...], w1_ref[...], preferred_element_type=jnp.float32)
    h1 = jax.nn.sigmoid(h1 + b1_ref[...])
    # fc2 + sigmoid
    h2 = jnp.dot(h1.astype(jnp.bfloat16), w2_ref[...], preferred_element_type=jnp.float32)
    h2 = jax.nn.sigmoid(h2 + b2_ref[...])
    # fc3 (lane-dense padded output; only column 0 is the real logit)
    y = jnp.dot(h2.astype(jnp.bfloat16), w3_ref[...], preferred_element_type=jnp.float32)
    o_ref[...] = y + b3_ref[...]


def _chunking(batch):
    """Pick (padded_batch, chunk_rows) so padded_batch % chunk_rows == 0."""
    if batch <= MAX_CHUNK:
        tb = max(8, ((batch + 7) // 8) * 8)      # sublane-friendly single chunk
        return tb, tb
    padded = ((batch + MAX_CHUNK - 1) // MAX_CHUNK) * MAX_CHUNK
    return padded, MAX_CHUNK


def td_network_batched(xb, params):
    """xb: (B, 14) float32 board features -> (B,) float32 values."""
    w1p, b1, w2, b2, w3p, b3p = params
    b = xb.shape[0]
    padded_b, tb = _chunking(b)

    # zero-pad batch to a chunk multiple and features 14 -> 128; cast to bf16
    xp = jnp.zeros((padded_b, PAD_IN), jnp.float32)
    xp = xp.at[:b, :INPUT_SIZE].set(xb.astype(jnp.float32)).astype(jnp.bfloat16)

    grid = (padded_b // tb,)
    flops = 2 * padded_b * (PAD_IN * HIDDEN_SIZE
                            + HIDDEN_SIZE * HIDDEN_SIZE
                            + HIDDEN_SIZE * PAD_OUT)
    bytes_accessed = (xp.size * 2
                      + w1p.size * 2 + w2.size * 2 + w3p.size * 2
                      + b1.size * 4 + b2.size * 4 + b3p.size * 4
                      + padded_b * PAD_OUT * 4)

    out = pl.pallas_call(
        td_network_kernel,
        out_shape=jax.ShapeDtypeStruct((padded_b, PAD_OUT), jnp.float32),
        grid=grid,
        in_specs=[
            # activations stream per chunk
            pl.BlockSpec((tb, PAD_IN), lambda i: (i, 0)),
            # weights/biases: constant block index -> stay resident in VMEM
            pl.BlockSpec((PAD_IN, HIDDEN_SIZE), lambda i: (0, 0)),
            pl.BlockSpec((1, HIDDEN_SIZE), lambda i: (0, 0)),
            pl.BlockSpec((HIDDEN_SIZE, HIDDEN_SIZE), lambda i: (0, 0)),
            pl.BlockSpec((1, HIDDEN_SIZE), lambda i: (0, 0)),
            pl.BlockSpec((HIDDEN_SIZE, PAD_OUT), lambda i: (0, 0)),
            pl.BlockSpec((1, PAD_OUT), lambda i: (0, 0)),
        ],
        out_specs=pl.BlockSpec((tb, PAD_OUT), lambda i: (i, 0)),
        compiler_params=pltpu.CompilerParams(dimension_semantics=("parallel",)),
        cost_estimate=pl.CostEstimate(
            flops=flops,
            transcendentals=2 * HIDDEN_SIZE * padded_b,
            bytes_accessed=bytes_accessed,
        ),
    )(xp, w1p, b1, w2, b2, w3p, b3p)

    return out[:b, 0]


def td_network_forward(x, params):
    """Original module semantics: (14,) float -> scalar float32."""
    y = td_network_batched(jnp.asarray(x, jnp.float32).reshape(1, INPUT_SIZE), params)
    return y.reshape(())


def init_params(key):
    """PyTorch nn.Linear-style init (uniform +/- 1/sqrt(fan_in)), f32,
    weights stored transposed as (in_features, out_features)."""
    k1, k2, k3, k4, k5, k6 = jax.random.split(key, 6)

    def uni(k, shape, fan_in):
        bound = 1.0 / jnp.sqrt(fan_in)
        return jax.random.uniform(k, shape, jnp.float32, -bound, bound)

    w1 = uni(k1, (INPUT_SIZE, HIDDEN_SIZE), INPUT_SIZE)
    b1 = uni(k2, (1, HIDDEN_SIZE), INPUT_SIZE)
    w2 = uni(k3, (HIDDEN_SIZE, HIDDEN_SIZE), HIDDEN_SIZE)
    b2 = uni(k4, (1, HIDDEN_SIZE), HIDDEN_SIZE)
    w3 = uni(k5, (HIDDEN_SIZE, 1), HIDDEN_SIZE)
    b3 = uni(k6, (1, 1), HIDDEN_SIZE)
    return (w1, b1, w2, b2, w3, b3)


def prepare_params(params_f32):
    """Pad fc1 K-dim to 128 and fc3 N-dim to 128; cast weights to bf16."""
    w1, b1, w2, b2, w3, b3 = params_f32
    w1p = jnp.zeros((PAD_IN, HIDDEN_SIZE), jnp.float32).at[:INPUT_SIZE].set(w1)
    w3p = jnp.zeros((HIDDEN_SIZE, PAD_OUT), jnp.float32).at[:, :1].set(w3)
    b3p = jnp.zeros((1, PAD_OUT), jnp.float32).at[:, :1].set(b3)
    return (w1p.astype(jnp.bfloat16), b1,
            w2.astype(jnp.bfloat16), b2,
            w3p.astype(jnp.bfloat16), b3p)


def td_network_ref(xb, params_f32):
    """Pure-JAX f32 reference on unpadded weights. xb: (B, 14) -> (B,)."""
    w1, b1, w2, b2, w3, b3 = params_f32
    h = jax.nn.sigmoid(xb.astype(jnp.float32) @ w1 + b1)
    h = jax.nn.sigmoid(h @ w2 + b2)
    return (h @ w3 + b3)[:, 0]


if __name__ == "__main__":
    key = jax.random.PRNGKey(0)
    k_param, k_x, k_xb = jax.random.split(key, 3)

    params_f32 = init_params(k_param)
    params = prepare_params(params_f32)

    # 1) single board position (exact original forward semantics)
    x = jax.random.uniform(k_x, (INPUT_SIZE,), jnp.float32)
    y = td_network_forward(x, params)
    jax.block_until_ready(y)
    y_ref = td_network_ref(x.reshape(1, INPUT_SIZE), params_f32)[0]
    assert jnp.allclose(y, y_ref, atol=1e-2, rtol=1e-2), (y, y_ref)

    # 2) small batch of positions (the throughput path)
    B = 16
    xb = jax.random.uniform(k_xb, (B, INPUT_SIZE), jnp.float32)
    yb = td_network_batched(xb, params)
    jax.block_until_ready(yb)
    yb_ref = td_network_ref(xb, params_f32)
    assert jnp.allclose(yb, yb_ref, atol=1e-2, rtol=1e-2), (yb, yb_ref)

    print("KERNEL_OK")
</pallas_src>

<mosaic_0001>
module attributes {stable_mosaic.version = 11 : i64} {
  func.func @td_network_kernel(%arg0: i32, %arg1: memref<8x128xbf16, #tpu.memory_space<vmem>>, %arg2: memref<128x256xbf16, #tpu.memory_space<vmem>>, %arg3: memref<1x256xf32, #tpu.memory_space<vmem>>, %arg4: memref<256x256xbf16, #tpu.memory_space<vmem>>, %arg5: memref<1x256xf32, #tpu.memory_space<vmem>>, %arg6: memref<256x128xbf16, #tpu.memory_space<vmem>>, %arg7: memref<1x128xf32, #tpu.memory_space<vmem>>, %arg8: memref<8x128xf32, #tpu.memory_space<vmem>>) attributes {dimension_semantics = [#tpu.dimension_semantics<parallel>], iteration_bounds = array<i64: 1>, scalar_prefetch = 0 : i64, scratch_operands = 0 : i64, tpu.core_type = #tpu.core_type<tc>, window_params = [{transform_indices = @transform_0, window_bounds = array<i64: 8, 128>}, {pipeline_mode = #tpu.pipeline_mode<synchronous>, transform_indices = @transform_1, window_bounds = array<i64: 128, 256>}, {pipeline_mode = #tpu.pipeline_mode<synchronous>, transform_indices = @transform_2, window_bounds = array<i64: 1, 256>}, {pipeline_mode = #tpu.pipeline_mode<synchronous>, transform_indices = @transform_3, window_bounds = array<i64: 256, 256>}, {pipeline_mode = #tpu.pipeline_mode<synchronous>, transform_indices = @transform_4, window_bounds = array<i64: 1, 256>}, {pipeline_mode = #tpu.pipeline_mode<synchronous>, transform_indices = @transform_5, window_bounds = array<i64: 256, 128>}, {pipeline_mode = #tpu.pipeline_mode<synchronous>, transform_indices = @transform_6, window_bounds = array<i64: 1, 128>}, {transform_indices = @transform_7, window_bounds = array<i64: 8, 128>}]} {
    %c0 = arith.constant 0 : index
    %c0_0 = arith.constant 0 : index
    %0 = vector.load %arg1[%c0, %c0_0] : memref<8x128xbf16, #tpu.memory_space<vmem>>, vector<8x128xbf16>
    %c0_1 = arith.constant 0 : index
    %c0_2 = arith.constant 0 : index
    %1 = vector.load %arg2[%c0_1, %c0_2] : memref<128x256xbf16, #tpu.memory_space<vmem>>, vector<128x256xbf16>
    %cst = arith.constant dense<0.000000e+00> : vector<8x256xf32>
    %2 = tpu.matmul %0, %1, %cst {dimension_numbers = #tpu.dot_dimension_numbers<[1], [0], [0], [1], [0, 0, 1, 1], [], []>} : vector<8x128xbf16>, vector<128x256xbf16>, vector<8x256xf32> -> vector<8x256xf32>
    %c0_3 = arith.constant 0 : index
    %c0_4 = arith.constant 0 : index
    %3 = vector.load %arg3[%c0_3, %c0_4] : memref<1x256xf32, #tpu.memory_space<vmem>>, vector<1x256xf32>
    %4 = vector.broadcast %3 : vector<1x256xf32> to vector<8x256xf32>
    %5 = arith.addf %2, %4 : vector<8x256xf32>
    %6 = arith.negf %5 : vector<8x256xf32>
    %7 = math.exp %6 : vector<8x256xf32>
    %cst_5 = arith.constant 1.000000e+00 : f32
    %8 = vector.broadcast %cst_5 : f32 to vector<8x256xf32>
    %9 = arith.addf %8, %7 : vector<8x256xf32>
    %10 = arith.divf %8, %9 : vector<8x256xf32>
    %11 = arith.truncf %10 : vector<8x256xf32> to vector<8x256xbf16>
    %c0_6 = arith.constant 0 : index
    %c0_7 = arith.constant 0 : index
    %12 = vector.load %arg4[%c0_6, %c0_7] : memref<256x256xbf16, #tpu.memory_space<vmem>>, vector<256x256xbf16>
    %cst_8 = arith.constant dense<0.000000e+00> : vector<8x256xf32>
    %13 = tpu.matmul %11, %12, %cst_8 {dimension_numbers = #tpu.dot_dimension_numbers<[1], [0], [0], [1], [0, 0, 1, 1], [], []>} : vector<8x256xbf16>, vector<256x256xbf16>, vector<8x256xf32> -> vector<8x256xf32>
    %c0_9 = arith.constant 0 : index
    %c0_10 = arith.constant 0 : index
    %14 = vector.load %arg5[%c0_9, %c0_10] : memref<1x256xf32, #tpu.memory_space<vmem>>, vector<1x256xf32>
    %15 = vector.broadcast %14 : vector<1x256xf32> to vector<8x256xf32>
    %16 = arith.addf %13, %15 : vector<8x256xf32>
    %17 = arith.negf %16 : vector<8x256xf32>
    %18 = math.exp %17 : vector<8x256xf32>
    %cst_11 = arith.constant 1.000000e+00 : f32
    %19 = vector.broadcast %cst_11 : f32 to vector<8x256xf32>
    %20 = arith.addf %19, %18 : vector<8x256xf32>
    %21 = arith.divf %19, %20 : vector<8x256xf32>
    %22 = arith.truncf %21 : vector<8x256xf32> to vector<8x256xbf16>
    %c0_12 = arith.constant 0 : index
    %c0_13 = arith.constant 0 : index
    %23 = vector.load %arg6[%c0_12, %c0_13] : memref<256x128xbf16, #tpu.memory_space<vmem>>, vector<256x128xbf16>
    %cst_14 = arith.constant dense<0.000000e+00> : vector<8x128xf32>
    %24 = tpu.matmul %22, %23, %cst_14 {dimension_numbers = #tpu.dot_dimension_numbers<[1], [0], [0], [1], [0, 0, 1, 1], [], []>} : vector<8x256xbf16>, vector<256x128xbf16>, vector<8x128xf32> -> vector<8x128xf32>
    %c0_15 = arith.constant 0 : index
    %c0_16 = arith.constant 0 : index
    %25 = vector.load %arg7[%c0_15, %c0_16] : memref<1x128xf32, #tpu.memory_space<vmem>>, vector<1x128xf32>
    %26 = vector.broadcast %25 : vector<1x128xf32> to vector<8x128xf32>
    %27 = arith.addf %24, %26 : vector<8x128xf32>
    %c0_17 = arith.constant 0 : index
    %c0_18 = arith.constant 0 : index
    %28 = vector.load %arg8[%c0_17, %c0_18] : memref<8x128xf32, #tpu.memory_space<vmem>>, vector<8x128xf32>
    tpu.vector_store %arg8[%c0_17, %c0_18], %27 {strides = array<i32>} : memref<8x128xf32, #tpu.memory_space<vmem>>, vector<8x128xf32>,
    return
  }
  func.func @transform_0(%arg0: i32) -> (i32, i32) {
    %c0_i32 = arith.constant 0 : i32
    %c0_i32_0 = arith.constant 0 : i32
    return %arg0, %c0_i32 : i32, i32
  }
  func.func @transform_1(%arg0: i32) -> (i32, i32) {
    %c0_i32 = arith.constant 0 : i32
    %c0_i32_0 = arith.constant 0 : i32
    %c0_i32_1 = arith.constant 0 : i32
    return %c0_i32, %c0_i32_0 : i32, i32
  }
  func.func @transform_2(%arg0: i32) -> (i32, i32) {
    %c0_i32 = arith.constant 0 : i32
    %c0_i32_0 = arith.constant 0 : i32
    %c0_i32_1 = arith.constant 0 : i32
    return %c0_i32, %c0_i32_0 : i32, i32
  }
  func.func @transform_3(%arg0: i32) -> (i32, i32) {
    %c0_i32 = arith.constant 0 : i32
    %c0_i32_0 = arith.constant 0 : i32
    %c0_i32_1 = arith.constant 0 : i32
    return %c0_i32, %c0_i32_0 : i32, i32
  }
  func.func @transform_4(%arg0: i32) -> (i32, i32) {
    %c0_i32 = arith.constant 0 : i32
    %c0_i32_0 = arith.constant 0 : i32
    %c0_i32_1 = arith.constant 0 : i32
    return %c0_i32, %c0_i32_0 : i32, i32
  }
  func.func @transform_5(%arg0: i32) -> (i32, i32) {
    %c0_i32 = arith.constant 0 : i32
    %c0_i32_0 = arith.constant 0 : i32
    %c0_i32_1 = arith.constant 0 : i32
    return %c0_i32, %c0_i32_0 : i32, i32
  }
  func.func @transform_6(%arg0: i32) -> (i32, i32) {
    %c0_i32 = arith.constant 0 : i32
    %c0_i32_0 = arith.constant 0 : i32
    %c0_i32_1 = arith.constant 0 : i32
    return %c0_i32, %c0_i32_0 : i32, i32
  }
  func.func @transform_7(%arg0: i32) -> (i32, i32) {
    %c0_i32 = arith.constant 0 : i32
    %c0_i32_0 = arith.constant 0 : i32
    return %arg0, %c0_i32 : i32, i32
  }
}

</mosaic_0001>

<bundles_post_ra>
// kernel: tpu_custom_call.1
= control target key start
LH: loop header
LB: loop body
LE: loop exit
PB: predicated region body
PF: predicated region fallthrough
CT: control target
= control target key end

     0   :  { %12 = vsyncpa [#allocation3], 0  ;;  %s1149_s0 = inlined_call_operand.hbm [shape: bf16[8,128], index: 0, kind: input, shape index: {}]   ;;  %s1150_s1 = inlined_call_operand.hbm [shape: bf16[128,256], index: 1, kind: input, shape index: {}]   ;;  %s1151_s2 = inlined_call_operand.vmem [shape: f32[1,256], index: 2, kind: input, shape index: {}]   ;;  %s1152_s3 = inlined_call_operand.hbm [shape: bf16[256,256], index: 3, kind: input, shape index: {}]   ;;  %s1153_s4 = inlined_call_operand.vmem [shape: f32[1,256], index: 4, kind: input, shape index: {}]   ;;  %s1154_s5 = inlined_call_operand.hbm [shape: bf16[256,128], index: 5, kind: input, shape index: {}]   ;;  %s1155_s6 = inlined_call_operand.vmem [shape: f32[1,128], index: 6, kind: input, shape index: {}]   ;;  %s1156_s7 = inlined_call_operand.hbm [shape: f32[8,128], index: 7, kind: output, shape index: {}]  }
   0x1   :  { %13 = vsyncpa [#allocation6], 0 }
   0x2   :  { %14 = vsyncpa [#allocation9], 0 }
   0x3   :  { %15 = vsyncpa [#allocation4], 0  ;;  %s1020_s24 = smov [#allocation5]   ;;  %s902_s28 = scalar_lea.hbm %s1150_s1, 2048 }
   0x4   :  { %s31_s25 = sshll.u32 %s1020_s24, 4  ;;  %p903_p0 = scmp.ne.s32.totalorder %s1150_s1, %s902_s28  ;;  %s32_s25 = int_to_ptr.vmem [resolvable:$true] %s31_s25 }
   0x5   :  { %p906_p1 = scmp.lt.u32.totalorder %s902_s28, %s1150_s1 }
   0x7   :  { %p908_p2 = pnand %p906_p1, %p903_p0 }
   0x9   :  { %911 = shalt.err (!%p908_p2)
}
   0xa   :  { %s912_s10 = scalar_lea.vmem %s32_s25, 2048  ;;  %p917_p4 = scmp.lt.s32.totalorder %s32_s25, %s32_s25 }
   0xb   :  { %p913_p3 = scmp.ne.s32.totalorder %s32_s25, %s912_s10  ;;  %p918_p5 = scmp.lt.s32.totalorder %s912_s10, %s912_s10 }
   0xd   :  { %p919_p6 = por %p918_p5, %p917_p4 }
   0xf   :  { %p920_p7 = pnand %p919_p6, %p913_p3 }
  0x11   :  { %923 = shalt.err (!%p920_p7)
}
  0x12   :  { %s1021_s11 = smov 128   ;;  %s1022_s12 = smov 8  }
  0x13   :  { %37 = dma.hbm_to_vmem [thread:$0]  %s1150_s1, 2048, %s32_s25, [#allocation6], %s1021_s11, %s1021_s11, %s1022_s12  }
  0x14   :  { %s1023_s15 = smov [#allocation2]   ;;  %s1024_s17 = smov [#allocation7]  }
  0x15   :  { %s22_s16 = sshll.u32 %s1023_s15, 4  ;;  %s45_s18 = sshll.u32 %s1024_s17, 4  ;;  %s23_s16 = int_to_ptr.vmem [resolvable:$true] %s22_s16  ;;  %s46_s18 = int_to_ptr.vmem [resolvable:$true] %s45_s18 }
  0x16   :  { %s924_s21 = scalar_lea.hbm %s1149_s0, 64 }
  0x17   :  { %p925_p8 = scmp.ne.s32.totalorder %s1149_s0, %s924_s21  ;;  %p928_p9 = scmp.lt.u32.totalorder %s924_s21, %s1149_s0 }
  0x19   :  { %p930_p10 = pnand %p928_p9, %p925_p8 }
  0x1b   :  { %933 = shalt.err (!%p930_p10)
}
  0x1c   :  { %s934_s1 = scalar_lea.vmem %s23_s16, 64  ;;  %p939_p12 = scmp.lt.s32.totalorder %s23_s16, %s23_s16 }
  0x1d   :  { %p935_p11 = scmp.ne.s32.totalorder %s23_s16, %s934_s1  ;;  %p940_p13 = scmp.lt.s32.totalorder %s934_s1, %s934_s1 }
  0x1f   :  { %p941_p0 = por %p940_p13, %p939_p12 }
  0x21   :  { %p942_p1 = pnand %p941_p0, %p935_p11 }
  0x23   :  { %945 = shalt.err (!%p942_p1)
}
  0x24   :  { %25 = dma.hbm_to_vmem [thread:$0]  %s1149_s0, 64, %s23_s16, [#allocation3]  }
  0x25   :  { %s946_s30 = scalar_lea.hbm %s1152_s3, 4096 }
  0x26   :  { %p947_p2 = scmp.ne.s32.totalorder %s1152_s3, %s946_s30  ;;  %p950_p3 = scmp.lt.u32.totalorder %s946_s30, %s1152_s3 }
  0x28   :  { %p952_p4 = pnand %p950_p3, %p947_p2 }
  0x2a   :  { %955 = shalt.err (!%p952_p4)
}
  0x2b   :  { %s956_s14 = scalar_lea.vmem %s46_s18, 4096  ;;  %p961_p6 = scmp.lt.s32.totalorder %s46_s18, %s46_s18 }
  0x2c   :  { %p957_p5 = scmp.ne.s32.totalorder %s46_s18, %s956_s14  ;;  %p962_p7 = scmp.lt.s32.totalorder %s956_s14, %s956_s14 }
  0x2e   :  { %p963_p8 = por %p962_p7, %p961_p6 }
  0x30   :  { %p964_p9 = pnand %p963_p8, %p957_p5 }
  0x32   :  { %967 = shalt.err (!%p964_p9)
}
  0x33   :  { %51 = dma.hbm_to_vmem [thread:$0]  %s1152_s3, 4096, %s46_s18, [#allocation6], %s1021_s11, %s1021_s11, %s1022_s12  }
  0x34   :  { %s1025_s16 = smov [#allocation8]   ;;  %s968_s21 = scalar_lea.hbm %s1154_s5, 2048 }
  0x35   :  { %s59_s17 = sshll.u32 %s1025_s16, 4  ;;  %p969_p10 = scmp.ne.s32.totalorder %s1154_s5, %s968_s21  ;;  %s60_s17 = int_to_ptr.vmem [resolvable:$true] %s59_s17 }
  0x36   :  { %p972_p11 = scmp.lt.u32.totalorder %s968_s21, %s1154_s5 }
  0x38   :  { %p974_p12 = pnand %p972_p11, %p969_p10 }
  0x3a   :  { %977 = shalt.err (!%p974_p12)
}
  0x3b   :  { %s978_s1 = scalar_lea.vmem %s60_s17, 2048  ;;  %p983_p0 = scmp.lt.s32.totalorder %s60_s17, %s60_s17 }
  0x3c   :  { %p979_p13 = scmp.ne.s32.totalorder %s60_s17, %s978_s1  ;;  %p984_p1 = scmp.lt.s32.totalorder %s978_s1, %s978_s1 }
  0x3e   :  { %p985_p2 = por %p984_p1, %p983_p0 }
  0x40   :  { %p986_p3 = pnand %p985_p2, %p979_p13 }
  0x42   :  { %989 = shalt.err (!%p986_p3)
}
  0x43   :  { %s1026_s3 = smov 64   ;;  %s1027_s11 = smov 4  }
  0x44   :  { %65 = dma.hbm_to_vmem [thread:$0]  %s1154_s5, 2048, %s60_s17, [#allocation9], %s1026_s3, %s1026_s3, %s1027_s11  }
  0x45   :  { %1012 = dma.done.wait [#allocation3], 64  }
  0x46   :  { %1013 = vsyncadd [#allocation3], 4294967232 }
  0x47   :  { %1014 = dma.done.wait [#allocation6], 6144  }
  0x48   :  { %1015 = vsyncadd [#allocation6], 4294961152 }
  0x49   :  { %1016 = dma.done.wait [#allocation9], 2048  }
  0x4a   :  { %1017 = vsyncadd [#allocation9], 4294965248  ;;  %v1028_v0 = vmov 0   ;;  %v798_v1 = vld [vmem:[#allocation5 + $0x4] ss:$8 sps:$4 sm:$0xff]   ;;  %v100_v50 = vlaneseq  ;;  %s1029_s29 = smov [#allocation10]  }
  0x4b   :  { %222 = vmatprep.mubr.bf16.mxu0 %v1028_v0  ;;  %v800_v2 = vld [vmem:[#allocation5] ss:$8 sps:$4 sm:$0xff]   ;;  %190 = vmatprep.subr.bf16.mxu0 %v798_v1  ;;  %v801_v3 = vld [vmem:[#allocation5 + $0x14] ss:$8 sps:$4 sm:$0xff]   ;;  %v803_v4 = vld [vmem:[#allocation5 + $0x10] ss:$8 sps:$4 sm:$0xff]  }
  0x4c   :  { %191 = vmatpush1.bf16.msra.mxu0 %v800_v2  ;;  %v804_v5 = vld [vmem:[#allocation5 + $0x24] ss:$8 sps:$4 sm:$0xff]   ;;  %v806_v6 = vld [vmem:[#allocation5 + $0x20] ss:$8 sps:$4 sm:$0xff]   ;;  %v807_v7 = vld [vmem:[#allocation5 + $0x34] ss:$8 sps:$4 sm:$0xff]  }
  0x4d   :  { %192 = vmatprep.subr.bf16.mxu0 %v801_v3  ;;  %v809_v8 = vld [vmem:[#allocation5 + $0x30] ss:$8 sps:$4 sm:$0xff]   ;;  %v810_v9 = vld [vmem:[#allocation5 + $0x44] ss:$8 sps:$4 sm:$0xff]   ;;  %v824_v11 = vld [vmem:[#allocation7] ss:$8 sps:$4 sm:$0xff]  }
  0x4e   :  { %v822_v10 = vld [vmem:[#allocation7 + $0x4] ss:$8 sps:$4 sm:$0xff]   ;;  %v825_v12 = vld [vmem:[#allocation7 + $0x14] ss:$8 sps:$4 sm:$0xff]   ;;  %v812_v13 = vld [vmem:[#allocation5 + $0x40] ss:$8 sps:$4 sm:$0xff]  }
  0x4f   :  { %449 = vmatprep.subr.bf16.mxu1 %v822_v10  ;;  %v827_v14 = vld [vmem:[#allocation7 + $0x10] ss:$8 sps:$4 sm:$0xff]   ;;  %v828_v15 = vld [vmem:[#allocation7 + $0x24] ss:$8 sps:$4 sm:$0xff]   ;;  %v813_v16 = vld [vmem:[#allocation5 + $0x54] ss:$8 sps:$4 sm:$0xff]  }
  0x50   :  { %193 = vmatpush1.bf16.msra.mxu0 %v803_v4  ;;  %450 = vmatpush1.bf16.msra.mxu1 %v824_v11  ;;  %v815_v17 = vld [vmem:[#allocation5 + $0x50] ss:$8 sps:$4 sm:$0xff]   ;;  %v830_v18 = vld [vmem:[#allocation7 + $0x20] ss:$8 sps:$4 sm:$0xff]   ;;  %v831_v19 = vld [vmem:[#allocation7 + $0x34] ss:$8 sps:$4 sm:$0xff]  }
  0x51   :  { %194 = vmatprep.subr.bf16.mxu0 %v804_v5  ;;  %451 = vmatprep.subr.bf16.mxu1 %v825_v12  ;;  %v816_v20 = vld [vmem:[#allocation5 + $0x64] ss:$8 sps:$4 sm:$0xff]   ;;  %v818_v21 = vld [vmem:[#allocation5 + $0x60] ss:$8 sps:$4 sm:$0xff]   ;;  %v833_v22 = vld [vmem:[#allocation7 + $0x30] ss:$8 sps:$4 sm:$0xff]  }
  0x52   :  { %v834_v23 = vld [vmem:[#allocation7 + $0x44] ss:$8 sps:$4 sm:$0xff]   ;;  %v819_v24 = vld [vmem:[#allocation5 + $0x74] ss:$8 sps:$4 sm:$0xff]   ;;  %v836_v25 = vld [vmem:[#allocation7 + $0x40] ss:$8 sps:$4 sm:$0xff]  }
  0x53   :  { %v821_v26 = vld [vmem:[#allocation5 + $0x70] ss:$8 sps:$4 sm:$0xff]   ;;  %v837_v27 = vld [vmem:[#allocation7 + $0x54] ss:$8 sps:$4 sm:$0xff]   ;;  %v840_v30 = vld [vmem:[#allocation7 + $0x64] ss:$8 sps:$4 sm:$0xff]  }
  0x54   :  { %195 = vmatpush1.bf16.msra.mxu0 %v806_v6  ;;  %452 = vmatpush1.bf16.msra.mxu1 %v827_v14  ;;  %v839_v28 = vld [vmem:[#allocation7 + $0x50] ss:$8 sps:$4 sm:$0xff]   ;;  %v81_v29 = vld [vmem:[#allocation2] sm:$0xf]  ;;  %v842_v31 = vld [vmem:[#allocation7 + $0x60] ss:$8 sps:$4 sm:$0xff]  }
  0x55   :  { %196 = vmatprep.subr.bf16.mxu0 %v807_v7  ;;  %453 = vmatprep.subr.bf16.mxu1 %v828_v15  ;;  %v843_v32 = vld [vmem:[#allocation7 + $0x74] ss:$8 sps:$4 sm:$0xff]   ;;  %v845_v33 = vld [vmem:[#allocation7 + $0x70] ss:$8 sps:$4 sm:$0xff]   ;;  %v846_v34 = vld [vmem:[#allocation7 + $0x84] ss:$8 sps:$4 sm:$0xff]  }
  0x56   :  { %v848_v35 = vld [vmem:[#allocation7 + $0x80] ss:$8 sps:$4 sm:$0xff]   ;;  %v849_v36 = vld [vmem:[#allocation7 + $0x94] ss:$8 sps:$4 sm:$0xff]   ;;  %v851_v37 = vld [vmem:[#allocation7 + $0x90] ss:$8 sps:$4 sm:$0xff]  }
  0x57   :  { %v852_v38 = vld [vmem:[#allocation7 + $0xa4] ss:$8 sps:$4 sm:$0xff]   ;;  %v854_v39 = vld [vmem:[#allocation7 + $0xa0] ss:$8 sps:$4 sm:$0xff]   ;;  %v855_v40 = vld [vmem:[#allocation7 + $0xb4] ss:$8 sps:$4 sm:$0xff]  }
  0x58   :  { %197 = vmatpush1.bf16.msra.mxu0 %v809_v8  ;;  %454 = vmatpush1.bf16.msra.mxu1 %v830_v18  ;;  %v857_v41 = vld [vmem:[#allocation7 + $0xb0] ss:$8 sps:$4 sm:$0xff]   ;;  %v858_v42 = vld [vmem:[#allocation7 + $0xc4] ss:$8 sps:$4 sm:$0xff]   ;;  %v860_v43 = vld [vmem:[#allocation7 + $0xc0] ss:$8 sps:$4 sm:$0xff]  }
  0x59   :  { %198 = vmatprep.subr.bf16.mxu0 %v810_v9  ;;  %455 = vmatprep.subr.bf16.mxu1 %v831_v19  ;;  %v861_v44 = vld [vmem:[#allocation7 + $0xd4] ss:$8 sps:$4 sm:$0xff]   ;;  %v863_v45 = vld [vmem:[#allocation7 + $0xd0] ss:$8 sps:$4 sm:$0xff]   ;;  %v864_v46 = vld [vmem:[#allocation7 + $0xe4] ss:$8 sps:$4 sm:$0xff]  }
  0x5a   :  { %v866_v47 = vld [vmem:[#allocation7 + $0xe0] ss:$8 sps:$4 sm:$0xff]   ;;  %v867_v48 = vld [vmem:[#allocation7 + $0xf4] ss:$8 sps:$4 sm:$0xff]   ;;  %v869_v49 = vld [vmem:[#allocation7 + $0xf0] ss:$8 sps:$4 sm:$0xff]  }
  0x5b   :  { %v1124_v51 = vshrl.u32 %v100_v50, 7  ;;  %v98_v53 = vld [vmem:[%s1151_s2] sm:$0x3]  ;;  %v870_v9 = vld [vmem:[#allocation8 + $0x40] sm:$0xff]   ;;  %v872_v11 = vld [vmem:[#allocation8 + $0x48] sm:$0xff]   ;;  %s686_s30 = sshll.u32 %s1029_s29, 4  ;;  %s687_s30 = int_to_ptr.vmem [resolvable:$true] %s686_s30 }
  0x5c   :  { %199 = vmatpush1.bf16.msra.mxu0 %v812_v13  ;;  %456 = vmatpush1.bf16.msra.mxu1 %v833_v22  ;;  %v871_v10 = vld [vmem:[#allocation8] sm:$0xff]   ;;  %v873_v12 = vld [vmem:[#allocation8 + $0x8] sm:$0xff]   ;;  %v874_v13 = vld [vmem:[#allocation8 + $0x50] sm:$0xff]   ;;  %s990_s8 = scalar_lea.vmem %s687_s30, 128  ;;  %p995_p5 = scmp.lt.s32.totalorder %s687_s30, %s687_s30 }
  0x5d   :  { %200 = vmatprep.subr.bf16.mxu0 %v813_v16  ;;  %457 = vmatprep.subr.bf16.mxu1 %v834_v23  ;;  %v102_v52 = vsub.s32 0, %v1124_v51  ;;  %v106_v54 = vsub.s32 1, %v1124_v51  ;;  %v875_v14 = vld [vmem:[#allocation8 + $0x10] sm:$0xff]   ;;  %v876_v15 = vld [vmem:[#allocation8 + $0x58] sm:$0xff]   ;;  %v879_v18 = vld [vmem:[#allocation8 + $0x20] sm:$0xff]   ;;  %p991_p4 = scmp.ne.s32.totalorder %s687_s30, %s990_s8  ;;  %p996_p6 = scmp.lt.s32.totalorder %s990_s8, %s990_s8 }
  0x5e   :  { %v877_v16 = vld [vmem:[#allocation8 + $0x18] sm:$0xff]   ;;  %v880_v19 = vld [vmem:[#allocation8 + $0x68] sm:$0xff]   ;;  %v883_v22 = vld [vmem:[#allocation8 + $0x30] sm:$0xff]  }
  0x5f   :  { %v103_v55 = vrot.slane %v98_v53, %v102_v52  ;;  %v107_v56 = vrot.slane %v98_v53, %v106_v54  ;;  %v884_v23 = vld [vmem:[#allocation8 + $0x78] sm:$0xff]   ;;  %p997_p7 = por %p996_p6, %p995_p5 }
  0x60   :  { %201 = vmatpush1.bf16.msra.mxu0 %v815_v17  ;;  %458 = vmatpush1.bf16.msra.mxu1 %v836_v25  ;;  %v878_v17 = vld [vmem:[#allocation8 + $0x60] sm:$0xff]   ;;  %v277_v25 = vld [vmem:[%s1153_s4] sm:$0x3] }
  0x61   :  { %202 = vmatprep.subr.bf16.mxu0 %v816_v20  ;;  %459 = vmatprep.subr.bf16.mxu1 %v837_v27  ;;  %v881_v20 = vld [vmem:[#allocation8 + $0x28] sm:$0xff]   ;;  %v286_v27 = vrot.slane %v277_v25, %v106_v54  ;;  %p998_p8 = pnand %p997_p7, %p991_p4 }
  0x64   :  { %203 = vmatpush1.bf16.msra.mxu0 %v818_v21  ;;  %460 = vmatpush1.bf16.msra.mxu1 %v839_v28  ;;  %v882_v21 = vld [vmem:[#allocation8 + $0x70] sm:$0xff]  }
  0x65   :  { %204 = vmatprep.subr.bf16.mxu0 %v819_v24  ;;  %461 = vmatprep.subr.bf16.mxu1 %v840_v30  ;;  %v885_v24 = vld [vmem:[#allocation8 + $0x38] sm:$0xff]  }
  0x68   :  { %205 = vmatpush1.bf16.msra.mxu0 %v821_v26  ;;  %462 = vmatpush1.bf16.msra.mxu1 %v842_v31  ;;  %v282_v26 = vrot.slane %v277_v25, %v102_v52 }
  0x69   :  { %463 = vmatprep.subr.bf16.mxu1 %v843_v32  ;;  %766 = vmatprep.subr.bf16.mxu0 %v870_v9 }
  0x6b   :  { %223 = vmatmul.mubr.bf16.vlgmr.msra.gmra.mrb[0].mxu0 %v81_v29 }
  0x6c   :  { %464 = vmatpush1.bf16.msra.mxu1 %v845_v33  ;;  %767 = vmatpush3.bf16.msra.mxu0 %v871_v10 }
  0x6d   :  { %465 = vmatprep.subr.bf16.mxu1 %v846_v34  ;;  %768 = vmatprep.subr.bf16.mxu0 %v872_v11 }
  0x70   :  { %466 = vmatpush1.bf16.msra.mxu1 %v848_v35  ;;  %769 = vmatpush3.bf16.msra.mxu0 %v873_v12 }
  0x71   :  { %467 = vmatprep.subr.bf16.mxu1 %v849_v36  ;;  %770 = vmatprep.subr.bf16.mxu0 %v874_v13 }
  0x74   :  { %468 = vmatpush1.bf16.msra.mxu1 %v851_v37  ;;  %771 = vmatpush3.bf16.msra.mxu0 %v875_v14 }
  0x75   :  { %469 = vmatprep.subr.bf16.mxu1 %v852_v38  ;;  %772 = vmatprep.subr.bf16.mxu0 %v876_v15 }
  0x78   :  { %470 = vmatpush1.bf16.msra.mxu1 %v854_v39  ;;  %773 = vmatpush3.bf16.msra.mxu0 %v877_v16 }
  0x79   :  { %471 = vmatprep.subr.bf16.mxu1 %v855_v40  ;;  %774 = vmatprep.subr.bf16.mxu0 %v878_v17 }
  0x7c   :  { %472 = vmatpush1.bf16.msra.mxu1 %v857_v41  ;;  %775 = vmatpush3.bf16.msra.mxu0 %v879_v18 }
  0x7d   :  { %473 = vmatprep.subr.bf16.mxu1 %v858_v42  ;;  %776 = vmatprep.subr.bf16.mxu0 %v880_v19 }
  0x80   :  { %474 = vmatpush1.bf16.msra.mxu1 %v860_v43  ;;  %777 = vmatpush3.bf16.msra.mxu0 %v881_v20 }
  0x81   :  { %475 = vmatprep.subr.bf16.mxu1 %v861_v44  ;;  %778 = vmatprep.subr.bf16.mxu0 %v882_v21 }
  0x84   :  { %476 = vmatpush1.bf16.msra.mxu1 %v863_v45  ;;  %779 = vmatpush3.bf16.msra.mxu0 %v883_v22  ;;  %v749_v45 = vld [vmem:[%s1155_s6] ss:$0 sm:$0xff] }
  0x85   :  { %477 = vmatprep.subr.bf16.mxu1 %v864_v46  ;;  %780 = vmatprep.subr.bf16.mxu0 %v884_v23 }
  0x88   :  { %478 = vmatpush1.bf16.msra.mxu1 %v866_v47  ;;  %781 = vmatpush3.bf16.msra.mxu0 %v885_v24 }
  0x89   :  { %479 = vmatprep.subr.bf16.mxu1 %v867_v48 }
  0x8c   :  { %480 = vmatpush1.bf16.msra.mxu1 %v869_v49 }
 0x13e   :  { %v224_v57 = vpop.f32.mrb[0].mxu0 }
 0x13f   :  { %v225_v58 = vadd.f32 %v224_v57, %v103_v55  ;;  %v226_v59 = vpop.f32.mrb[1].mxu0 }
 0x140   :  { %v227_v60 = vadd.f32 %v226_v59, %v107_v56  ;;  %v228_v61 = vpop.f32.mrb[2].mxu0 }
 0x141   :  { %v713_v62 = vmul.f32 -1.442695, %v225_v58  ;;  %v229_v63 = vpop.f32.mrb[3].mxu0 }
 0x142   :  { %v714_v0 = vmul.f32 -1.442695, %v227_v60 }
 0x143   :  { %886 = vpow2.f32 %v713_v62 }
 0x144   :  { %888 = vpow2.f32 %v714_v0 }
 0x14d   :  { %v887_v1 = vpop.eup %886 }
 0x14e   :  { %v889_v2 = vpop.eup %888  ;;  %v237_v3 = vadd.f32 1.0, %v887_v1 }
 0x14f   :  { %v238_v4 = vadd.f32 1.0, %v889_v2 }
 0x150   :  { %890 = vrcp.f32 %v237_v3 }
 0x151   :  { %892 = vrcp.f32 %v238_v4 }
 0x15a   :  { %v891_v5 = vpop.eup %890 }
 0x15b   :  { %v893_v6 = vpop.eup %892  ;;  %v243_v8 = vpack.c.bf16 %v891_v5, %v891_v5 }
 0x15c   :  { %v244_v7 = vpack.c.bf16 %v893_v6, %v893_v6 }
 0x15e   :  { %481 = vmatprep.mubr.bf16.mxu1 %v244_v7 }
 0x15f   :  { %482 = vmatmul.mubr.bf16.vlgmr.msra.gmra.mrb[0].mxu1 %v243_v8 }
 0x232   :  { %v483_v28 = vpop.f32.mrb[0].mxu1 }
 0x233   :  { %v484_v29 = vadd.f32 %v483_v28, %v282_v26  ;;  %v485_v30 = vpop.f32.mrb[1].mxu1 }
 0x234   :  { %v486_v31 = vadd.f32 %v485_v30, %v286_v27  ;;  %v487_v32 = vpop.f32.mrb[2].mxu1 }
 0x235   :  { %v747_v33 = vmul.f32 -1.442695, %v484_v29  ;;  %v488_v34 = vpop.f32.mrb[3].mxu1 }
 0x236   :  { %v748_v35 = vmul.f32 -1.442695, %v486_v31 }
 0x237   :  { %894 = vpow2.f32 %v747_v33 }
 0x238   :  { %896 = vpow2.f32 %v748_v35 }
 0x241   :  { %v895_v36 = vpop.eup %894 }
 0x242   :  { %v897_v37 = vpop.eup %896  ;;  %v496_v38 = vadd.f32 1.0, %v895_v36 }
 0x243   :  { %v497_v39 = vadd.f32 1.0, %v897_v37 }
 0x244   :  { %898 = vrcp.f32 %v496_v38 }
 0x245   :  { %900 = vrcp.f32 %v497_v39 }
 0x24e   :  { %v899_v40 = vpop.eup %898 }
 0x24f   :  { %v901_v41 = vpop.eup %900  ;;  %v502_v43 = vpack.c.bf16 %v899_v40, %v899_v40 }
 0x250   :  { %v503_v42 = vpack.c.bf16 %v901_v41, %v901_v41 }
 0x252   :  { %671 = vmatprep.mubr.bf16.mxu0 %v503_v42 }
 0x253   :  { %672 = vmatmul.mubr.bf16.vlgmr.msra.gmra.mrb[4].mxu0 %v502_v43 }
 0x326   :  { %v782_v44 = vpop.f32.mrb[4].mxu0 }
 0x327   :  { %v783_v46 = vpop.f32.mrb[5].mxu0 }
 0x328   :  { %v784_v47 = vadd.f32 %v783_v46, %v782_v44  ;;  %v785_v48 = vpop.f32.mrb[6].mxu0 }
 0x329   :  { %v786_v49 = vpop.f32.mrb[7].mxu0 }
 0x32a   :  { %v674_v50 = vadd.f32 %v784_v47, %v749_v45 }
 0x32c   :  { %679 = vst [vmem:[#allocation10] sm:$0xff] %v674_v50 }
 0x32d   :  { %1001 = shalt.err (!%p998_p8)
}
 0x32e   :  { %s1002_s6 = scalar_lea.hbm %s1156_s7, 128 }
 0x32f   :  { %p1003_p9 = scmp.ne.s32.totalorder %s1156_s7, %s1002_s6  ;;  %p1006_p10 = scmp.lt.u32.totalorder %s1002_s6, %s1156_s7 }
 0x331   :  { %p1008_p11 = pnand %p1006_p10, %p1003_p9 }
 0x333   :  { %1011 = shalt.err (!%p1008_p11)
}
 0x334   :  { %689 = dma.vmem_to_hbm [thread:$0]  %s687_s30, 128, %s1156_s7, [#allocation4]  }
 0x335   :  { %1018 = dma.done.wait [#allocation4], 128  }
 0x336   :  { %1019 = vsyncadd [#allocation4], 4294967168 }
 0x337   :  { %693 = vsyncpa [#allocation3], 1 }
 0x338   :  { %694 = vsyncpa [#allocation6], 1 }
 0x339   :  { %695 = vsyncpa [#allocation9], 1 }
 0x33a   :  { %696 = vsyncpa [#allocation4], 1 }

</bundles_post_ra>
